<compile_context>
chip_gen: v5e
topology: v5e:2x2
jax: 0.10.0
libtpu: 0.0.40
codegen_flags: <defaults>
</compile_context>

<pallas_src>
import functools

import jax
import jax.numpy as jnp
from jax.experimental import pallas as pl
from jax.experimental.pallas import tpu as pltpu


_LANE = 128                           # lane-padding multiple for matmul N dims
_ACT_VMEM_BUDGET = 20 * 1024 * 1024   # activation-block budget (scoped limit below is 48 MiB)
_M_TARGET = 1024                      # target MXU M fill (B_blk * L)


def _round_up(x, m):
    return -(-x // m) * m


# --------------------------------------------------------------------------
# Fused forward kernel
# --------------------------------------------------------------------------

def _make_gcae_kernel(B_blk, L, E, taps, Lpa, Ea, aspect_kernel_sizes, Ncp, APad):
    """Build the fused GCAE forward kernel (closure over the static config)."""
    nA = len(aspect_kernel_sizes)

    def kernel(*refs):
        it = iter(refs)
        asp_ref = next(it)                        # (B_blk, Lpa, Ea)     f32
        sent_ref = next(it)                       # (B_blk, L + 2P, E)   f32
        aw = [next(it) for _ in range(nA)]        # (aks*Ea, APad)       bf16
        ab = [next(it) for _ in range(nA)]        # (1, APad)            f32
        alin_w = next(it)                         # (nA*APad, Ncp)       bf16
        alin_b = next(it)                         # (1, Ncp)             f32
        sw = next(it)                             # (taps*E, 2*Ncp)      bf16
        sb = next(it)                             # (1, 2*Ncp)           f32
        lin_w = next(it)                          # (Ncp, OutP)          bf16
        lin_b = next(it)                          # (1, OutP)            f32
        out_ref = next(it)                        # (B_blk, OutP)        f32

        # ----- aspect branch: relu(conv) -> max_t -> (packed) linear --------
        asp = asp_ref[...].astype(jnp.bfloat16)          # cast once, pre-im2col
        afeats = []
        for i, aks in enumerate(aspect_kernel_sizes):
            lout = Lpa - aks + 1
            win = jnp.concatenate(
                [asp[:, k:k + lout, :] for k in range(aks)], axis=-1)
            y = jnp.dot(win.reshape(B_blk * lout, aks * Ea), aw[i][...],
                        preferred_element_type=jnp.float32) + ab[i][...]
            y = jax.nn.relu(y).reshape(B_blk, lout, APad)
            # NOTE: max over time includes padded boundary positions — faithful
            # to PyTorch Conv1d(padding=aspect_embed_size // 2) + max over len.
            afeats.append(jnp.max(y, axis=1))            # (B_blk, APad)
        asp_cat = afeats[0] if nA == 1 else jnp.concatenate(afeats, axis=-1)
        # alin_w is packed so the result is already tiled over the nK gate
        # blocks and lane-padded to Ncp -> one broadcast add in the gate below.
        asp_gate = (jnp.dot(asp_cat.astype(jnp.bfloat16), alin_w[...],
                            preferred_element_type=jnp.float32)
                    + alin_b[...])                       # (B_blk, Ncp)

        # ----- sentence branch: ONE conv+gate matmul, whole-slab gating ------
        x = sent_ref[...].astype(jnp.bfloat16)           # cast once, pre-im2col
        win = jnp.concatenate(
            [x[:, k:k + L, :] for k in range(taps)], axis=-1)   # (B, L, taps*E)
        y = jnp.dot(win.reshape(B_blk * L, taps * E), sw[...],
                    preferred_element_type=jnp.float32) + sb[...]
        y = y.reshape(B_blk, L, 2 * Ncp)
        conv = jnp.tanh(y[:, :, :Ncp])                            # whole slab
        gate = jax.nn.relu(y[:, :, Ncp:] + asp_gate[:, None, :])  # whole slab
        feat = jnp.max(conv * gate, axis=1)                       # (B_blk, Ncp)

        # Dropout == identity at inference; final linear fused, lane-dense out.
        out_ref[...] = (jnp.dot(feat.astype(jnp.bfloat16), lin_w[...],
                                preferred_element_type=jnp.float32)
                        + lin_b[...])

    return kernel


# --------------------------------------------------------------------------
# Weight packing (done once, outside the forward)
# --------------------------------------------------------------------------

def pack_gcae_params(params, kernel_sizes, kernel_num,
                     aspect_kernel_sizes, aspect_kernel_num,
                     embed_size, aspect_embed_size, lane=_LANE):
    """Pack conv+gate weights of all kernel sizes into one lane-padded im2col
    matrix (columns = [conv slab | gate slab]); pad/tile the linears to match."""
    # TODO(synk): even sentence kernel sizes give per-size output lengths and
    # cannot share one im2col window; they would need a per-size path.
    assert all(k % 2 == 1 for k in kernel_sizes), "odd sentence kernel sizes required"

    P = max(k // 2 for k in kernel_sizes)
    taps = 2 * P + 1
    nK = len(kernel_sizes)
    K = kernel_num
    E = embed_size
    nA = len(aspect_kernel_sizes)
    Ak = aspect_kernel_num
    Ea = aspect_embed_size

    Ncp = _round_up(nK * K, lane)          # conv slab == gate slab width
    APad = _round_up(Ak, lane)             # aspect conv channels, lane-padded
    n_classes = params["lin_w"].shape[1]
    OutP = _round_up(n_classes, lane)      # lane-dense output block

    # Sentence conv + gate, all kernel sizes, one matrix.
    sw = jnp.zeros((taps * E, 2 * Ncp), jnp.float32)
    sb = jnp.zeros((1, 2 * Ncp), jnp.float32)
    for i, ks in enumerate(kernel_sizes):
        off = P - ks // 2                  # tap offset inside the max window
        wc = params[f"conv_w_{i}"].reshape(ks * E, K)   # tap-major im2col rows
        wg = params[f"gate_w_{i}"].reshape(ks * E, K)
        sw = sw.at[off * E:(off + ks) * E, i * K:(i + 1) * K].set(wc)
        sw = sw.at[off * E:(off + ks) * E, Ncp + i * K:Ncp + (i + 1) * K].set(wg)
        sb = sb.at[:, i * K:(i + 1) * K].set(params[f"conv_b_{i}"])
        sb = sb.at[:, Ncp + i * K:Ncp + (i + 1) * K].set(params[f"gate_b_{i}"])

    # Aspect linear, tiled over the nK gate blocks and lane-padded, so the
    # kernel adds it to the whole gate slab with a single broadcast.
    alin_w = params["aspect_lin_w"]        # (nA*Ak, K)
    alin_b = params["aspect_lin_b"]        # (1, K)
    alin_w_p = jnp.zeros((nA * APad, Ncp), jnp.float32)
    alin_b_p = jnp.zeros((1, Ncp), jnp.float32)
    for i in range(nA):
        rows = alin_w[i * Ak:(i + 1) * Ak, :]
        for j in range(nK):
            alin_w_p = alin_w_p.at[i * APad:i * APad + Ak, j * K:(j + 1) * K].set(rows)
    for j in range(nK):
        alin_b_p = alin_b_p.at[:, j * K:(j + 1) * K].set(alin_b)

    # Final linear, row/column zero-padded to the lane-padded feature width.
    lin_w_p = jnp.zeros((Ncp, OutP), jnp.float32)
    lin_w_p = lin_w_p.at[:nK * K, :n_classes].set(params["lin_w"])
    lin_b_p = jnp.zeros((1, OutP), jnp.float32)
    lin_b_p = lin_b_p.at[:, :n_classes].set(params["lin_b"])

    packed = {
        "embed": params["embed"],
        "aspect_embed": params["aspect_embed"],
        "sw": sw.astype(jnp.bfloat16),
        "sb": sb,
        "alin_w": alin_w_p.astype(jnp.bfloat16),
        "alin_b": alin_b_p,
        "lin_w": lin_w_p.astype(jnp.bfloat16),
        "lin_b": lin_b_p,
    }
    for i, aks in enumerate(aspect_kernel_sizes):
        aw = params[f"aspect_conv_w_{i}"].reshape(aks * Ea, Ak)
        aw_p = jnp.zeros((aks * Ea, APad), jnp.float32).at[:, :Ak].set(aw)
        ab_p = jnp.zeros((1, APad), jnp.float32).at[:, :Ak].set(
            params[f"aspect_conv_b_{i}"])
        packed[f"aw_{i}"] = aw_p.astype(jnp.bfloat16)
        packed[f"ab_{i}"] = ab_p
    return packed


# --------------------------------------------------------------------------
# Batch-block selection (VMEM budget + MXU M-fill + v7x 2-TC split)
# --------------------------------------------------------------------------

def _choose_b_blk(B, L, Lp, E, Lpa, Ea, taps, ncp, out_p):
    per_row = (2 * Lp * E * 4            # sentence input block, dbl-buffered f32
               + 2 * Lpa * Ea * 4        # aspect input block, dbl-buffered f32
               + L * taps * E * 2        # bf16 im2col window
               + 3 * L * 2 * ncp * 4     # matmul result + conv/gate/prod temps
               + 2 * out_p * 4)          # output block, dbl-buffered
    b_vmem = max(1, _ACT_VMEM_BUDGET // per_row)
    b_blk = min(B, b_vmem)
    # v7x has 2 TensorCores: keep >= 2 parallel grid steps whenever splitting
    # still leaves M = B_blk*L at/above the target fill.
    if b_blk >= B and B * L >= 2 * _M_TARGET:
        b_blk = -(-B // 2)
    if b_blk < B:
        # Multi-step grid: keep the (8,128) layout rule on the 2-D output block.
        b_blk = max(8, (b_blk // 8) * 8)
    return b_blk


# --------------------------------------------------------------------------
# Forward (single pallas_call)
# --------------------------------------------------------------------------

@functools.partial(
    jax.jit,
    static_argnames=("kernel_sizes", "kernel_num",
                     "aspect_kernel_sizes", "aspect_kernel_num",
                     "aspect_embed_size", "n_classes"))
def gcae_forward(packed, sentence_ids, aspect_ids, *,
                 kernel_sizes, kernel_num,
                 aspect_kernel_sizes, aspect_kernel_num, aspect_embed_size,
                 n_classes=2):
    # Embedding lookups stay as plain XLA gathers (glue).
    sent = jnp.take(packed["embed"], sentence_ids, axis=0)          # (B, L, E)
    asp = jnp.take(packed["aspect_embed"], aspect_ids, axis=0)      # (B, La, Ea)
    B, L, E = sent.shape
    La, Ea = asp.shape[1], asp.shape[2]

    P = max(k // 2 for k in kernel_sizes)
    taps = 2 * P + 1
    apad = aspect_embed_size // 2          # faithful to the reference module
    Lp = L + 2 * P
    Lpa = La + 2 * apad
    nA = len(aspect_kernel_sizes)

    Ncp = packed["sb"].shape[1] // 2
    APad = packed["ab_0"].shape[1]
    OutP = packed["lin_b"].shape[1]

    B_blk = _choose_b_blk(B, L, Lp, E, Lpa, Ea, taps, Ncp, OutP)
    B_pad = -(-B // B_blk) * B_blk         # pad the batch instead of asserting

    # One pad per branch; zero rows for the padded batch tail (discarded below).
    sent_pad = jnp.pad(sent, ((0, B_pad - B), (P, P), (0, 0)))
    asp_pad = jnp.pad(asp, ((0, B_pad - B), (apad, apad), (0, 0)))

    kernel = _make_gcae_kernel(B_blk, L, E, taps, Lpa, Ea,
                               aspect_kernel_sizes, Ncp, APad)

    inputs = ([asp_pad, sent_pad]
              + [packed[f"aw_{i}"] for i in range(nA)]
              + [packed[f"ab_{i}"] for i in range(nA)]
              + [packed["alin_w"], packed["alin_b"],
                 packed["sw"], packed["sb"],
                 packed["lin_w"], packed["lin_b"]])

    # Weights use a constant index_map so they are not re-fetched across grid
    # steps.  (Single-buffering them via pipeline_mode=pl.Buffered(1) would
    # reclaim a little more VMEM headroom on v7x; left at the default here.)
    in_specs = ([pl.BlockSpec((B_blk, Lpa, Ea), lambda i: (i, 0, 0)),
                 pl.BlockSpec((B_blk, Lp, E), lambda i: (i, 0, 0))]
                + [pl.BlockSpec(w.shape, lambda i: (0, 0)) for w in inputs[2:]])
    out_specs = pl.BlockSpec((B_blk, OutP), lambda i: (i, 0))

    logits_pad = pl.pallas_call(
        kernel,
        out_shape=jax.ShapeDtypeStruct((B_pad, OutP), jnp.float32),
        grid=(B_pad // B_blk,),
        in_specs=in_specs,
        out_specs=out_specs,
        compiler_params=pltpu.CompilerParams(
            dimension_semantics=("parallel",),
            vmem_limit_bytes=48 * 1024 * 1024),
    )(*inputs)

    return logits_pad[:B, :n_classes]


# --------------------------------------------------------------------------
# Pure-JAX float32 reference (mirrors the PyTorch module)
# --------------------------------------------------------------------------

def gcae_reference(params, sentence_ids, aspect_ids, *,
                   kernel_sizes, aspect_kernel_sizes, aspect_embed_size):
    sent = jnp.take(params["embed"], sentence_ids, axis=0)
    asp = jnp.take(params["aspect_embed"], aspect_ids, axis=0)

    def conv1d(x, w, b, pad):              # x: (B, L, Cin), w: (ks, Cin, Cout)
        xp = jnp.pad(x, ((0, 0), (pad, pad), (0, 0)))
        ks = w.shape[0]
        lout = xp.shape[1] - ks + 1
        acc = jnp.zeros((x.shape[0], lout, w.shape[2]), jnp.float32)
        for k in range(ks):
            acc = acc + jnp.einsum("blc,cd->bld", xp[:, k:k + lout, :], w[k])
        return acc + b[0][None, None, :]

    apad = aspect_embed_size // 2
    afeats = [jnp.max(jax.nn.relu(
        conv1d(asp, params[f"aspect_conv_w_{i}"], params[f"aspect_conv_b_{i}"],
               apad)), axis=1) for i in range(len(aspect_kernel_sizes))]
    avec = (jnp.concatenate(afeats, axis=1) @ params["aspect_lin_w"]
            + params["aspect_lin_b"][0])

    sfeats = []
    for i, ks in enumerate(kernel_sizes):
        c = conv1d(sent, params[f"conv_w_{i}"], params[f"conv_b_{i}"], ks // 2)
        g = conv1d(sent, params[f"gate_w_{i}"], params[f"gate_b_{i}"], ks // 2)
        sfeats.append(jnp.max(jnp.tanh(c) * jax.nn.relu(g + avec[:, None, :]),
                              axis=1))
    feat = jnp.concatenate(sfeats, axis=1)
    return feat @ params["lin_w"] + params["lin_b"][0]


# --------------------------------------------------------------------------
# Params / main
# --------------------------------------------------------------------------

def init_params(key, vocab, embed_size, aspect_vocab, aspect_embed_size,
                kernel_num, kernel_sizes, aspect_kernel_num, aspect_kernel_sizes):
    ks = iter(jax.random.split(key, 64))
    p = {}
    p["embed"] = 0.1 * jax.random.normal(next(ks), (vocab, embed_size), jnp.float32)
    p["aspect_embed"] = 0.1 * jax.random.normal(
        next(ks), (aspect_vocab, aspect_embed_size), jnp.float32)
    for i, k in enumerate(kernel_sizes):
        p[f"conv_w_{i}"] = 0.1 * jax.random.normal(
            next(ks), (k, embed_size, kernel_num), jnp.float32)
        p[f"conv_b_{i}"] = 0.1 * jax.random.normal(next(ks), (1, kernel_num), jnp.float32)
        p[f"gate_w_{i}"] = 0.1 * jax.random.normal(
            next(ks), (k, embed_size, kernel_num), jnp.float32)
        p[f"gate_b_{i}"] = 0.1 * jax.random.normal(next(ks), (1, kernel_num), jnp.float32)
    for i, k in enumerate(aspect_kernel_sizes):
        p[f"aspect_conv_w_{i}"] = 0.1 * jax.random.normal(
            next(ks), (k, aspect_embed_size, aspect_kernel_num), jnp.float32)
        p[f"aspect_conv_b_{i}"] = 0.1 * jax.random.normal(
            next(ks), (1, aspect_kernel_num), jnp.float32)
    p["aspect_lin_w"] = 0.1 * jax.random.normal(
        next(ks), (len(aspect_kernel_sizes) * aspect_kernel_num, kernel_num), jnp.float32)
    p["aspect_lin_b"] = 0.1 * jax.random.normal(next(ks), (1, kernel_num), jnp.float32)
    p["lin_w"] = 0.1 * jax.random.normal(
        next(ks), (len(kernel_sizes) * kernel_num, 2), jnp.float32)
    p["lin_b"] = 0.1 * jax.random.normal(next(ks), (1, 2), jnp.float32)
    return p


if __name__ == "__main__":
    # small synthetic config (all sentence kernel sizes odd -> shared im2col window)
    B, L, La = 2, 16, 6
    vocab, embed_size = 50, 32
    aspect_vocab, aspect_embed_size = 20, 8
    kernel_num, kernel_sizes = 16, (3, 5)
    aspect_kernel_num, aspect_kernel_sizes = 8, (3,)
    # dropout = 0.5 -> identity at inference

    key = jax.random.PRNGKey(0)
    kp, ks_ids, ka_ids = jax.random.split(key, 3)
    params = init_params(kp, vocab, embed_size, aspect_vocab, aspect_embed_size,
                         kernel_num, kernel_sizes,
                         aspect_kernel_num, aspect_kernel_sizes)
    packed = pack_gcae_params(params, kernel_sizes, kernel_num,
                              aspect_kernel_sizes, aspect_kernel_num,
                              embed_size, aspect_embed_size)

    sentence_ids = jax.random.randint(ks_ids, (B, L), 0, vocab, dtype=jnp.int32)
    aspect_ids = jax.random.randint(ka_ids, (B, La), 0, aspect_vocab, dtype=jnp.int32)

    logits = gcae_forward(packed, sentence_ids, aspect_ids,
                          kernel_sizes=kernel_sizes, kernel_num=kernel_num,
                          aspect_kernel_sizes=aspect_kernel_sizes,
                          aspect_kernel_num=aspect_kernel_num,
                          aspect_embed_size=aspect_embed_size,
                          n_classes=2)
    jax.block_until_ready(logits)
    assert logits.shape == (B, 2)

    ref = gcae_reference(params, sentence_ids, aspect_ids,
                         kernel_sizes=kernel_sizes,
                         aspect_kernel_sizes=aspect_kernel_sizes,
                         aspect_embed_size=aspect_embed_size)
    err = float(jnp.max(jnp.abs(logits - jnp.asarray(ref, jnp.float32))))
    assert err < 3e-2, f"kernel/reference mismatch: max |err| = {err}"
    print("KERNEL_OK")
</pallas_src>

<mosaic_0001>
module attributes {stable_mosaic.version = 11 : i64} {
  func.func @kernel(%arg0: i32, %arg1: memref<2x14x8xf32, #tpu.memory_space<vmem>>, %arg2: memref<2x20x32xf32, #tpu.memory_space<vmem>>, %arg3: memref<24x128xbf16, #tpu.memory_space<vmem>>, %arg4: memref<1x128xf32, #tpu.memory_space<vmem>>, %arg5: memref<128x128xbf16, #tpu.memory_space<vmem>>, %arg6: memref<1x128xf32, #tpu.memory_space<vmem>>, %arg7: memref<160x256xbf16, #tpu.memory_space<vmem>>, %arg8: memref<1x256xf32, #tpu.memory_space<vmem>>, %arg9: memref<128x128xbf16, #tpu.memory_space<vmem>>, %arg10: memref<1x128xf32, #tpu.memory_space<vmem>>, %arg11: memref<2x128xf32, #tpu.memory_space<vmem>>) attributes {dimension_semantics = [#tpu.dimension_semantics<parallel>], iteration_bounds = array<i64: 1>, scalar_prefetch = 0 : i64, scratch_operands = 0 : i64, tpu.core_type = #tpu.core_type<tc>, window_params = [{transform_indices = @transform_0, window_bounds = array<i64: 2, 14, 8>}, {transform_indices = @transform_1, window_bounds = array<i64: 2, 20, 32>}, {pipeline_mode = #tpu.pipeline_mode<synchronous>, transform_indices = @transform_2, window_bounds = array<i64: 24, 128>}, {pipeline_mode = #tpu.pipeline_mode<synchronous>, transform_indices = @transform_3, window_bounds = array<i64: 1, 128>}, {pipeline_mode = #tpu.pipeline_mode<synchronous>, transform_indices = @transform_4, window_bounds = array<i64: 128, 128>}, {pipeline_mode = #tpu.pipeline_mode<synchronous>, transform_indices = @transform_5, window_bounds = array<i64: 1, 128>}, {pipeline_mode = #tpu.pipeline_mode<synchronous>, transform_indices = @transform_6, window_bounds = array<i64: 160, 256>}, {pipeline_mode = #tpu.pipeline_mode<synchronous>, transform_indices = @transform_7, window_bounds = array<i64: 1, 256>}, {pipeline_mode = #tpu.pipeline_mode<synchronous>, transform_indices = @transform_8, window_bounds = array<i64: 128, 128>}, {pipeline_mode = #tpu.pipeline_mode<synchronous>, transform_indices = @transform_9, window_bounds = array<i64: 1, 128>}, {transform_indices = @transform_10, window_bounds = array<i64: 2, 128>}]} {
    %c0 = arith.constant 0 : index
    %c0_0 = arith.constant 0 : index
    %c0_1 = arith.constant 0 : index
    %0 = vector.load %arg1[%c0, %c0_0, %c0_1] : memref<2x14x8xf32, #tpu.memory_space<vmem>>, vector<2x14x8xf32>
    %1 = arith.truncf %0 : vector<2x14x8xf32> to vector<2x14x8xbf16>
    %2 = vector.extract_strided_slice %1 {offsets = [0, 0, 0], sizes = [2, 12, 8], strides = [1, 1, 1]} : vector<2x14x8xbf16> to vector<2x12x8xbf16>
    %3 = vector.extract_strided_slice %1 {offsets = [0, 1, 0], sizes = [2, 12, 8], strides = [1, 1, 1]} : vector<2x14x8xbf16> to vector<2x12x8xbf16>
    %4 = vector.extract_strided_slice %1 {offsets = [0, 2, 0], sizes = [2, 12, 8], strides = [1, 1, 1]} : vector<2x14x8xbf16> to vector<2x12x8xbf16>
    %5 = tpu.concatenate %2, %3, %4 in 2 : vector<2x12x8xbf16>, vector<2x12x8xbf16>, vector<2x12x8xbf16> -> vector<2x12x24xbf16>
    %6 = vector.shape_cast %5 : vector<2x12x24xbf16> to vector<24x24xbf16>
    %c0_2 = arith.constant 0 : index
    %c0_3 = arith.constant 0 : index
    %7 = vector.load %arg3[%c0_2, %c0_3] : memref<24x128xbf16, #tpu.memory_space<vmem>>, vector<24x128xbf16>
    %cst = arith.constant dense<0.000000e+00> : vector<24x128xf32>
    %8 = tpu.matmul %6, %7, %cst {dimension_numbers = #tpu.dot_dimension_numbers<[1], [0], [0], [1], [0, 0, 1, 1], [], []>} : vector<24x24xbf16>, vector<24x128xbf16>, vector<24x128xf32> -> vector<24x128xf32>
    %c0_4 = arith.constant 0 : index
    %c0_5 = arith.constant 0 : index
    %9 = vector.load %arg4[%c0_4, %c0_5] : memref<1x128xf32, #tpu.memory_space<vmem>>, vector<1x128xf32>
    %10 = vector.broadcast %9 : vector<1x128xf32> to vector<24x128xf32>
    %11 = arith.addf %8, %10 : vector<24x128xf32>
    %cst_6 = arith.constant 0.000000e+00 : f32
    %12 = vector.broadcast %cst_6 : f32 to vector<24x128xf32>
    %13 = arith.maximumf %11, %12 : vector<24x128xf32>
    %14 = vector.shape_cast %13 : vector<24x128xf32> to vector<2x12x128xf32>
    %cst_7 = arith.constant dense<0xFF800000> : vector<2x128xf32>
    %15 = vector.multi_reduction <maximumf>, %14, %cst_7 [1] : vector<2x12x128xf32> to vector<2x128xf32>
    %16 = arith.truncf %15 : vector<2x128xf32> to vector<2x128xbf16>
    %c0_8 = arith.constant 0 : index
    %c0_9 = arith.constant 0 : index
    %17 = vector.load %arg5[%c0_8, %c0_9] : memref<128x128xbf16, #tpu.memory_space<vmem>>, vector<128x128xbf16>
    %cst_10 = arith.constant dense<0.000000e+00> : vector<2x128xf32>
    %18 = tpu.matmul %16, %17, %cst_10 {dimension_numbers = #tpu.dot_dimension_numbers<[1], [0], [0], [1], [0, 0, 1, 1], [], []>} : vector<2x128xbf16>, vector<128x128xbf16>, vector<2x128xf32> -> vector<2x128xf32>
    %c0_11 = arith.constant 0 : index
    %c0_12 = arith.constant 0 : index
    %19 = vector.load %arg6[%c0_11, %c0_12] : memref<1x128xf32, #tpu.memory_space<vmem>>, vector<1x128xf32>
    %20 = vector.broadcast %19 : vector<1x128xf32> to vector<2x128xf32>
    %21 = arith.addf %18, %20 : vector<2x128xf32>
    %c0_13 = arith.constant 0 : index
    %c0_14 = arith.constant 0 : index
    %c0_15 = arith.constant 0 : index
    %22 = vector.load %arg2[%c0_13, %c0_14, %c0_15] : memref<2x20x32xf32, #tpu.memory_space<vmem>>, vector<2x20x32xf32>
    %23 = arith.truncf %22 : vector<2x20x32xf32> to vector<2x20x32xbf16>
    %24 = vector.extract_strided_slice %23 {offsets = [0, 0, 0], sizes = [2, 16, 32], strides = [1, 1, 1]} : vector<2x20x32xbf16> to vector<2x16x32xbf16>
    %25 = vector.extract_strided_slice %23 {offsets = [0, 1, 0], sizes = [2, 16, 32], strides = [1, 1, 1]} : vector<2x20x32xbf16> to vector<2x16x32xbf16>
    %26 = vector.extract_strided_slice %23 {offsets = [0, 2, 0], sizes = [2, 16, 32], strides = [1, 1, 1]} : vector<2x20x32xbf16> to vector<2x16x32xbf16>
    %27 = vector.extract_strided_slice %23 {offsets = [0, 3, 0], sizes = [2, 16, 32], strides = [1, 1, 1]} : vector<2x20x32xbf16> to vector<2x16x32xbf16>
    %28 = vector.extract_strided_slice %23 {offsets = [0, 4, 0], sizes = [2, 16, 32], strides = [1, 1, 1]} : vector<2x20x32xbf16> to vector<2x16x32xbf16>
    %29 = tpu.concatenate %24, %25, %26, %27, %28 in 2 : vector<2x16x32xbf16>, vector<2x16x32xbf16>, vector<2x16x32xbf16>, vector<2x16x32xbf16>, vector<2x16x32xbf16> -> vector<2x16x160xbf16>
    %30 = vector.shape_cast %29 : vector<2x16x160xbf16> to vector<32x160xbf16>
    %c0_16 = arith.constant 0 : index
    %c0_17 = arith.constant 0 : index
    %31 = vector.load %arg7[%c0_16, %c0_17] : memref<160x256xbf16, #tpu.memory_space<vmem>>, vector<160x256xbf16>
    %cst_18 = arith.constant dense<0.000000e+00> : vector<32x256xf32>
    %32 = tpu.matmul %30, %31, %cst_18 {dimension_numbers = #tpu.dot_dimension_numbers<[1], [0], [0], [1], [0, 0, 1, 1], [], []>} : vector<32x160xbf16>, vector<160x256xbf16>, vector<32x256xf32> -> vector<32x256xf32>
    %c0_19 = arith.constant 0 : index
    %c0_20 = arith.constant 0 : index
    %33 = vector.load %arg8[%c0_19, %c0_20] : memref<1x256xf32, #tpu.memory_space<vmem>>, vector<1x256xf32>
    %34 = vector.broadcast %33 : vector<1x256xf32> to vector<32x256xf32>
    %35 = arith.addf %32, %34 : vector<32x256xf32>
    %36 = vector.shape_cast %35 : vector<32x256xf32> to vector<2x16x256xf32>
    %37 = vector.extract_strided_slice %36 {offsets = [0, 0, 0], sizes = [2, 16, 128], strides = [1, 1, 1]} : vector<2x16x256xf32> to vector<2x16x128xf32>
    %38 = math.tanh %37 : vector<2x16x128xf32>
    %39 = vector.extract_strided_slice %36 {offsets = [0, 0, 128], sizes = [2, 16, 128], strides = [1, 1, 1]} : vector<2x16x256xf32> to vector<2x16x128xf32>
    %40 = vector.shape_cast %21 : vector<2x128xf32> to vector<2x1x128xf32>
    %41 = vector.broadcast %40 : vector<2x1x128xf32> to vector<2x16x128xf32>
    %42 = arith.addf %39, %41 : vector<2x16x128xf32>
    %cst_21 = arith.constant 0.000000e+00 : f32
    %43 = vector.broadcast %cst_21 : f32 to vector<2x16x128xf32>
    %44 = arith.maximumf %42, %43 : vector<2x16x128xf32>
    %45 = arith.mulf %38, %44 : vector<2x16x128xf32>
    %cst_22 = arith.constant dense<0xFF800000> : vector<2x128xf32>
    %46 = vector.multi_reduction <maximumf>, %45, %cst_22 [1] : vector<2x16x128xf32> to vector<2x128xf32>
    %47 = arith.truncf %46 : vector<2x128xf32> to vector<2x128xbf16>
    %c0_23 = arith.constant 0 : index
    %c0_24 = arith.constant 0 : index
    %48 = vector.load %arg9[%c0_23, %c0_24] : memref<128x128xbf16, #tpu.memory_space<vmem>>, vector<128x128xbf16>
    %cst_25 = arith.constant dense<0.000000e+00> : vector<2x128xf32>
    %49 = tpu.matmul %47, %48, %cst_25 {dimension_numbers = #tpu.dot_dimension_numbers<[1], [0], [0], [1], [0, 0, 1, 1], [], []>} : vector<2x128xbf16>, vector<128x128xbf16>, vector<2x128xf32> -> vector<2x128xf32>
    %c0_26 = arith.constant 0 : index
    %c0_27 = arith.constant 0 : index
    %50 = vector.load %arg10[%c0_26, %c0_27] : memref<1x128xf32, #tpu.memory_space<vmem>>, vector<1x128xf32>
    %51 = vector.broadcast %50 : vector<1x128xf32> to vector<2x128xf32>
    %52 = arith.addf %49, %51 : vector<2x128xf32>
    %c0_28 = arith.constant 0 : index
    %c0_29 = arith.constant 0 : index
    %53 = vector.load %arg11[%c0_28, %c0_29] : memref<2x128xf32, #tpu.memory_space<vmem>>, vector<2x128xf32>
    tpu.vector_store %arg11[%c0_28, %c0_29], %52 {strides = array<i32>} : memref<2x128xf32, #tpu.memory_space<vmem>>, vector<2x128xf32>,
    return
  }
  func.func @transform_0(%arg0: i32) -> (i32, i32, i32) {
    %c0_i32 = arith.constant 0 : i32
    %c0_i32_0 = arith.constant 0 : i32
    %c0_i32_1 = arith.constant 0 : i32
    return %arg0, %c0_i32, %c0_i32_0 : i32, i32, i32
  }
  func.func @transform_1(%arg0: i32) -> (i32, i32, i32) {
    %c0_i32 = arith.constant 0 : i32
    %c0_i32_0 = arith.constant 0 : i32
    %c0_i32_1 = arith.constant 0 : i32
    return %arg0, %c0_i32, %c0_i32_0 : i32, i32, i32
  }
  func.func @transform_2(%arg0: i32) -> (i32, i32) {
    %c0_i32 = arith.constant 0 : i32
    %c0_i32_0 = arith.constant 0 : i32
    %c0_i32_1 = arith.constant 0 : i32
    return %c0_i32, %c0_i32_0 : i32, i32
  }
  func.func @transform_3(%arg0: i32) -> (i32, i32) {
    %c0_i32 = arith.constant 0 : i32
    %c0_i32_0 = arith.constant 0 : i32
    %c0_i32_1 = arith.constant 0 : i32
    return %c0_i32, %c0_i32_0 : i32, i32
  }
  func.func @transform_4(%arg0: i32) -> (i32, i32) {
    %c0_i32 = arith.constant 0 : i32
    %c0_i32_0 = arith.constant 0 : i32
    %c0_i32_1 = arith.constant 0 : i32
    return %c0_i32, %c0_i32_0 : i32, i32
  }
  func.func @transform_5(%arg0: i32) -> (i32, i32) {
    %c0_i32 = arith.constant 0 : i32
    %c0_i32_0 = arith.constant 0 : i32
    %c0_i32_1 = arith.constant 0 : i32
    return %c0_i32, %c0_i32_0 : i32, i32
  }
  func.func @transform_6(%arg0: i32) -> (i32, i32) {
    %c0_i32 = arith.constant 0 : i32
    %c0_i32_0 = arith.constant 0 : i32
    %c0_i32_1 = arith.constant 0 : i32
    return %c0_i32, %c0_i32_0 : i32, i32
  }
  func.func @transform_7(%arg0: i32) -> (i32, i32) {
    %c0_i32 = arith.constant 0 : i32
    %c0_i32_0 = arith.constant 0 : i32
    %c0_i32_1 = arith.constant 0 : i32
    return %c0_i32, %c0_i32_0 : i32, i32
  }
  func.func @transform_8(%arg0: i32) -> (i32, i32) {
    %c0_i32 = arith.constant 0 : i32
    %c0_i32_0 = arith.constant 0 : i32
    %c0_i32_1 = arith.constant 0 : i32
    return %c0_i32, %c0_i32_0 : i32, i32
  }
  func.func @transform_9(%arg0: i32) -> (i32, i32) {
    %c0_i32 = arith.constant 0 : i32
    %c0_i32_0 = arith.constant 0 : i32
    %c0_i32_1 = arith.constant 0 : i32
    return %c0_i32, %c0_i32_0 : i32, i32
  }
  func.func @transform_10(%arg0: i32) -> (i32, i32) {
    %c0_i32 = arith.constant 0 : i32
    %c0_i32_0 = arith.constant 0 : i32
    return %arg0, %c0_i32 : i32, i32
  }
}

</mosaic_0001>

<bundles_post_ra>
// kernel: gcae_forward.1
= control target key start
LH: loop header
LB: loop body
LE: loop exit
PB: predicated region body
PF: predicated region fallthrough
CT: control target
= control target key end

     0   :  { %s1339_s0 = inlined_call_operand.vmem [shape: f32[2,14,8], index: 0, kind: input, shape index: {}]   ;;  %s1340_s1 = inlined_call_operand.vmem [shape: f32[2,20,32], index: 1, kind: input, shape index: {}]   ;;  %s1341_s2 = inlined_call_operand.vmem [shape: bf16[24,128], index: 2, kind: input, shape index: {}]   ;;  %s1342_s3 = inlined_call_operand.vmem [shape: f32[1,128], index: 3, kind: input, shape index: {}]   ;;  %s1343_s4 = inlined_call_operand.vmem [shape: bf16[128,128], index: 4, kind: input, shape index: {}]   ;;  %s1344_s5 = inlined_call_operand.vmem [shape: f32[1,128], index: 5, kind: input, shape index: {}]   ;;  %s1345_s6 = inlined_call_operand.vmem [shape: bf16[160,256], index: 6, kind: input, shape index: {}]   ;;  %s1346_s7 = inlined_call_operand.vmem [shape: f32[1,256], index: 7, kind: input, shape index: {}]   ;;  %s1347_s8 = inlined_call_operand.vmem [shape: bf16[128,128], index: 8, kind: input, shape index: {}]   ;;  %s1348_s9 = inlined_call_operand.vmem [shape: f32[1,128], index: 9, kind: input, shape index: {}]   ;;  %s1349_s10 = inlined_call_operand.hbm [shape: f32[2,128], index: 10, kind: output, shape index: {}]  }
   0x1   :  { %v39_v0 = vld [vmem:[%s1339_s0 + $0x10] sm:$0xff]  ;;  %v40_v1 = vld [vmem:[%s1339_s0 + $0x18] sm:$0x3f]  ;;  %v37_v2 = vld [vmem:[%s1339_s0] sm:$0xff] }
   0x2   :  { %v43_v3 = vpack.c.bf16 %v39_v0, %v39_v0  ;;  %v44_v4 = vpack.c.bf16 %v40_v1, %v40_v1  ;;  %v38_v5 = vld [vmem:[%s1339_s0 + $0x8] sm:$0x3f]  ;;  %v41_v6 = vpack.c.bf16 %v37_v2, %v37_v2 }
   0x3   :  { %v42_v7 = vpack.c.bf16 %v38_v5, %v38_v5 }
   0x4   :  { %15 = vsyncpa [#allocation3], 0  ;;  %v51_v8 = vunpack.c.l.b16 %v43_v3  ;;  %v52_v9 = vunpack.c.l.b16 %v44_v4  ;;  %v49_v10 = vunpack.c.l.b16 %v41_v6  ;;  %s990_s0 = smov 8   ;;  %s991_s21 = smov 16   ;;  %v290_v24 = vld [vmem:[%s1340_s1] sm:$0xff]  ;;  %v291_v25 = vld [vmem:[%s1340_s1 + $0x8] sm:$0xff] }
   0x5   :  { %v50_v11 = vunpack.c.l.b16 %v42_v7  ;;  %v292_v26 = vld [vmem:[%s1340_s1 + $0x10] sm:$0xf]  ;;  %v296_v27 = vpack.c.bf16 %v290_v24, %v290_v24  ;;  %v297_v28 = vpack.c.bf16 %v291_v25, %v291_v25  ;;  %v97_v35 = vld [vmem:[%s1341_s2 + $0x8] sm:$0xf]  ;;  %vm133_vm0 = vcmask 1043456   ;;  %v910_v50 = vld [vmem:[%s1341_s2] sm:$0xff] }
   0x6   :  { %v1063_v12 = vpack.c.b16 %v52_v9, %v51_v8  ;;  %v298_v29 = vpack.c.bf16 %v292_v26, %v292_v26  ;;  %v124_v40 = vunpack.c.l.b16 %v97_v35  ;;  %vm358_vm1 = vsmask.f32 6400  ;;  %s992_s12 = smov 96   ;;  %v293_v51 = vld [vmem:[%s1340_s1 + $0x18] sm:$0xff]  ;;  %v294_v52 = vld [vmem:[%s1340_s1 + $0x20] sm:$0xff]  ;;  %s747_s20 = sshll.u32 %s1349_s10, 4  ;;  %s748_s20 = int_to_ptr.hbm [resolvable:$true] %s747_s20 }
   0x7   :  { %v1065_v13 = vpack.c.b16 %v50_v11, %v49_v10  ;;  %v306_v30 = vunpack.c.l.b16 %v296_v27  ;;  %v307_v31 = vunpack.c.l.b16 %v297_v28  ;;  %v299_v53 = vpack.c.bf16 %v293_v51, %v293_v51  ;;  %v295_v55 = vld [vmem:[%s1340_s1 + $0x28] sm:$0xf]  ;;  %s993_s1 = smov 32   ;;  %v852_v24 = vld [vmem:[%s1345_s6 + $0x70] sm:$0xf] }
   0x8   :  { %v63_v14 = vshrl.u32 %v1063_v12, 16  ;;  %v65_v15 = vshll.u32 %v1063_v12, 16  ;;  %v74_v22 = vrot.slane %v1063_v12, 1  ;;  %v314_v32 = vunpack.c.l.b16 %v298_v29  ;;  %v934_v25 = vld [vmem:[%s1345_s6 + $0x74] sm:$0xf0] }
   0x9   :  { %v56_v16 = vshrl.u32 %v1065_v13, 16  ;;  %v58_v17 = vshll.u32 %v1065_v13, 16  ;;  %v73_v23 = vrot.slane %v1065_v13, 1  ;;  %v1082_v33 = vpack.c.b16 %v307_v31, %v306_v30  ;;  %v844_v29 = vld [vmem:[%s1345_s6 + $0x60] sm:$0xf] }
   0xa   :  { %v67_v18 = vrot.slane %v65_v15, 1  ;;  %v1084_v34 = vpack.c.b16 %v314_v32, %v314_v32  ;;  %v126_v45 = vpack.c.b16 %v124_v40, %v124_v40  ;;  %v300_v54 = vpack.c.bf16 %v294_v52, %v294_v52  ;;  %v932_v30 = vld [vmem:[%s1345_s6 + $0x64] sm:$0xf0] }
   0xb   :  { %v60_v19 = vrot.slane %v58_v17, 1  ;;  %v320_v36 = vshrl.u32 %v1082_v33, 16  ;;  %v322_v37 = vshll.u32 %v1082_v33, 16  ;;  %v301_v56 = vpack.c.bf16 %v295_v55, %v295_v55  ;;  %v928_v55 = vld [vmem:[%s1345_s6 + $0x44] sm:$0xf0] }
   0xc   :  { %v68_v20 = vor.u32 %v67_v18, %v63_v14  ;;  %v327_v38 = vshll.u32 %v1084_v34, 16  ;;  %v362_v39 = vshrl.u32 %v1084_v34, 16  ;;  %v135_v48 = vsel %vm133_vm0, %v126_v45, 0  ;;  %v930_v45 = vld [vmem:[%s1345_s6 + $0x54] sm:$0xf0] }
   0xd   :  { %v61_v21 = vor.u32 %v60_v19, %v56_v16  ;;  %v359_v41 = vrot.slane %v320_v36, 1  ;;  %v360_v42 = vrot.slane %v322_v37, 2  ;;  %143 = vmatpush.bf16.msra.mxu0 %v135_v48  ;;  %v308_v57 = vunpack.c.l.b16 %v299_v53  ;;  %v936_v48 = vld [vmem:[%s1345_s6 + $0x84] sm:$0xf0] }
   0xe   :  { %71 = vrot.lane.b32.xlu1 %v68_v20, %s990_s0  ;;  %v364_v43 = vrot.slane %v362_v39, 1  ;;  %v365_v44 = vrot.slane %v327_v38, 2  ;;  %v309_v58 = vunpack.c.l.b16 %v300_v54  ;;  %v315_v60 = vunpack.c.l.b16 %v301_v56  ;;  %v828_v54 = vld [vmem:[%s1345_s6 + $0x40] sm:$0xf] }
   0xf   :  { %69 = vrot.lane.b32.xlu0 %v61_v21, %s990_s0  ;;  %v361_v46 = vor.u32 %v360_v42, %v359_v41  ;;  %v324_v61 = vrot.slane %v322_v37, 1  ;;  %v329_v62 = vrot.slane %v327_v38, 1  ;;  %vm318_vm2 = vsmask.f32 7424  ;;  %v868_v37 = vld [vmem:[%s1345_s6 + $0x90] sm:$0xf] }
  0x10   :  { %v366_v47 = vor.u32 %v365_v44, %v364_v43  ;;  %v1108_v59 = vpack.c.b16 %v309_v58, %v308_v57  ;;  %v1110_v63 = vpack.c.b16 %v315_v60, %v315_v60  ;;  %v348_v21 = vrot.slane %v1082_v33, 1  ;;  %v938_v38 = vld [vmem:[%s1345_s6 + $0x94] sm:$0xf0]  ;;  %v836_v42 = vld [vmem:[%s1345_s6 + $0x50] sm:$0xf] }
  0x11   :  { %144 = vmatpush.bf16.msra.mxu0 %v910_v50  ;;  %v325_v2 = vor.u32 %v324_v61, %v320_v36  ;;  %vm79_vm3 = vcmask 64512   ;;  %vm84_vm4 = vcmask 130048   ;;  %vm347_vm5 = vcmask 1046528   ;;  %v926_v58 = vld [vmem:[%s1345_s6 + $0x34] sm:$0xf0] }
  0x12   :  { %v367_v49 = vsel %vm358_vm1, %v361_v46, %v366_v47  ;;  %v332_v0 = vshrl.u32 %v1108_v59, 16  ;;  %v334_v1 = vshll.u32 %v1108_v59, 16  ;;  %v339_v4 = vshll.u32 %v1110_v63, 16  ;;  %v860_v47 = vld [vmem:[%s1345_s6 + $0x80] sm:$0xf] }
  0x13   :  { %v330_v7 = vsel %vm318_vm2, %v325_v2, %v329_v62  ;;  %v371_v8 = vshrl.u32 %v1110_v63, 16  ;;  %v853_v28 = vor.u32 %v934_v25, %v852_v24  ;;  %v352_v36 = vrot.slane %v1110_v63, 1  ;;  %v812_v62 = vld [vmem:[%s1345_s6 + $0x20] sm:$0xf]  ;;  %v937_v25 = vld [vmem:[%s1345_s6 + $0x94] sm:$0xf] }
  0x14   :  { %v336_v3 = vrot.slane %v334_v1, 1  ;;  %v368_v5 = vrot.slane %v332_v0, 1  ;;  %v369_v6 = vrot.slane %v334_v1, 2  ;;  %v341_v10 = vrot.slane %v339_v4, 1  ;;  %343 = vrot.lane.b32.xlu2 %v330_v7, %s993_s1  ;;  %v922_v7 = vld [vmem:[%s1345_s6 + $0x14] sm:$0xf0] }
  0x15   :  { %v374_v11 = vrot.slane %v339_v4, 2  ;;  %v373_v15 = vrot.slane %v371_v8, 1  ;;  %537 = vmatpush.bf16.msra.mxu2 %v853_v28  ;;  %v845_v41 = vor.u32 %v932_v30, %v844_v29  ;;  %v869_v46 = vor.u32 %v938_v38, %v868_v37  ;;  %v854_v4 = vld [vmem:[%s1345_s6 + $0x78] sm:$0xf0]  ;;  %v931_v8 = vld [vmem:[%s1345_s6 + $0x64] sm:$0xf] }
  0x16   :  { %77 = vrot.lane.b32.xlu1 %v74_v22, %s991_s21  ;;  %v337_v9 = vor.u32 %v336_v3, %v332_v0  ;;  %v370_v14 = vor.u32 %v369_v6, %v368_v5  ;;  %v349_v22 = vrot.slane %v1084_v34, 1  ;;  %v861_v50 = vor.u32 %v936_v48, %v860_v47  ;;  %v924_v0 = vld [vmem:[%s1345_s6 + $0x24] sm:$0xf0]  ;;  %v933_v3 = vld [vmem:[%s1345_s6 + $0x74] sm:$0xf] }
  0x17   :  { %75 = vrot.lane.b32.xlu0 %v73_v23, %s991_s21  ;;  %v375_v17 = vor.u32 %v374_v11, %v373_v15  ;;  %s994_s21 = smov 64   ;;  %562 = vmatpush.bf16.msra.mxu3 %v869_v46  ;;  %v837_v51 = vor.u32 %v930_v45, %v836_v42  ;;  %vm381_vm6 = vcmask 1045504   ;;  %v382_v52 = vrot.slane %v1082_v33, 2  ;;  %v804_v5 = vld [vmem:[%s1345_s6 + $0x10] sm:$0xf] }
  0x18   :  { %v342_v16 = vsel %vm318_vm2, %v337_v9, %v341_v10  ;;  %v350_v23 = vsel %vm347_vm5, %v348_v21, %v349_v22  ;;  %v383_v53 = vrot.slane %v1084_v34, 2  ;;  %vm388_vm7 = vcmask 261120   ;;  %v820_v34 = vld [vmem:[%s1345_s6 + $0x30] sm:$0xf]  ;;  %v846_v9 = vld [vmem:[%s1345_s6 + $0x68] sm:$0xf0] }
  0x19   :  { %v376_v20 = vsel %vm358_vm1, %v370_v14, %v375_v17  ;;  %538 = vmatpush.bf16.msra.mxu2 %v845_v41  ;;  %v829_v57 = vor.u32 %v928_v55, %v828_v54  ;;  %vm128_vm8 = vcmask 195584   ;;  %v821_v61 = vor.u32 %v926_v58, %v820_v34  ;;  %v796_v11 = vld [vmem:[%s1345_s6] sm:$0xf]  ;;  %v920_v14 = vld [vmem:[%s1345_s6 + $0x4] sm:$0xf0]  ;;  %v917_v54 = vld [vmem:[%s1343_s4 + $0x30] sm:$0xff] }
  0x1a   :  { %v1171_v56 = vsel %vm381_vm6, %v382_v52, %v383_v53  ;;  %v813_v1 = vor.u32 %v924_v0, %v812_v62  ;;  %v857_v6 = vor.u32 %v933_v3, %v854_v4  ;;  %v805_v10 = vor.u32 %v922_v7, %v804_v5  ;;  %v929_v17 = vld [vmem:[%s1345_s6 + $0x54] sm:$0xf]  ;;  %v927_v22 = vld [vmem:[%s1345_s6 + $0x44] sm:$0xf]  ;;  %v870_v28 = vld [vmem:[%s1345_s6 + $0x98] sm:$0xf0] }
  0x1b   :  { %563 = vmatpush.bf16.msra.mxu3 %v861_v50  ;;  %v849_v15 = vor.u32 %v931_v8, %v846_v9  ;;  %v386_v21 = vrot.slane %v1110_v63, 2  ;;  %v925_v63 = vld [vmem:[%s1345_s6 + $0x34] sm:$0xf]  ;;  %v873_v29 = vor.u32 %v937_v25, %v870_v28  ;;  %vm393_vm9 = vcmask 523264   ;;  %v862_v46 = vld [vmem:[%s1345_s6 + $0x88] sm:$0xf0] }
  0x1c   :  { %354 = vrot.lane.b32.xlu2 %v350_v23, %s994_s21  ;;  %575 = vmatpush.bf16.msrb.mxu0 %v857_v6  ;;  %v830_v23 = vld [vmem:[%s1345_s6 + $0x48] sm:$0xf0]  ;;  %vm398_vm10 = vcmask 785408   ;;  %v921_v42 = vld [vmem:[%s1345_s6 + $0x14] sm:$0xf]  ;;  %v918_v53 = vld [vmem:[%s1343_s4 + $0x38] sm:$0xff] }
  0x1d   :  { %539 = vmatpush.bf16.msra.mxu2 %v837_v51  ;;  %v833_v24 = vor.u32 %v927_v22, %v830_v23  ;;  %v919_v51 = vld [vmem:[%s1345_s6 + $0x4] sm:$0xf]  ;;  %277 = vmatpush.bf16.msra.mxu1 %v918_v53  ;;  %v916_v55 = vld [vmem:[%s1343_s4 + $0x28] sm:$0xff]  ;;  %v913_v0 = vld [vmem:[%s1343_s4 + $0x10] sm:$0xff]  ;;  %vm225_vm11 = vcmask 1041409  }
  0x1e   :  { %345 = vrot.lane.b32.xlu1 %v342_v16, %s993_s1  ;;  %874 = vmatmul.msk.bf16.vlgmr.msra.gmra.mxu3 %vm388_vm7, %v1171_v56  ;;  %v797_v16 = vor.u32 %v920_v14, %v796_v11  ;;  %v912_v3 = vld [vmem:[%s1343_s4 + $0x8] sm:$0xff]  ;;  %v911_v6 = vld [vmem:[%s1343_s4] sm:$0xff]  ;;  %s995_s1 = smov [#allocation2]  }
  0x1f   :  { %377 = vrot.lane.b32.xlu0 %v367_v49, %s992_s12  ;;  %600 = vmatpush.bf16.msrb.mxu3 %v873_v29  ;;  %v425_v53 = vld [vmem:[%s1346_s7] sm:$0x3]  ;;  %s745_s2 = sshll.u32 %s995_s1, 4  ;;  %s746_s2 = int_to_ptr.vmem [resolvable:$true] %s745_s2 }
  0x20   :  { %576 = vmatpush.bf16.msrb.mxu0 %v849_v15 }
  0x21   :  { %540 = vmatpush.bf16.msra.mxu2 %v829_v57  ;;  %278 = vmatpush.bf16.msra.mxu1 %v917_v54  ;;  %v915_v57 = vld [vmem:[%s1343_s4 + $0x20] sm:$0xff]  ;;  %v941_v54 = vld [vmem:[%s1347_s8 + $0x10] sm:$0xff] }
  0x25   :  { %541 = vmatpush.bf16.msra.mxu2 %v821_v61  ;;  %279 = vmatpush.bf16.msra.mxu1 %v916_v55 }
  0x27   :  { %379 = vrot.lane.b32.xlu0 %v376_v20, %s992_s12  ;;  %v385_v20 = vrot.slane %v1108_v59, 2 }
  0x29   :  { %542 = vmatpush.bf16.msra.mxu2 %v813_v1  ;;  %280 = vmatpush.bf16.msra.mxu1 %v915_v57  ;;  %v940_v57 = vld [vmem:[%s1347_s8 + $0x8] sm:$0xff] }
  0x2d   :  { %543 = vmatpush.bf16.msra.mxu2 %v805_v10 }
  0x31   :  { %544 = vmatpush.bf16.msra.mxu2 %v797_v16 }
  0x80   :  { %v72_v18 = vpop.permute.xlu1 %71 }
  0x81   :  { %v70_v19 = vpop.permute.xlu0 %69  ;;  %v83_v26 = vsel %vm79_vm3, %v1063_v12, %v72_v18  ;;  %v351_v12 = vrot.slane %v1108_v59, 1  ;;  %v838_v18 = vld [vmem:[%s1345_s6 + $0x58] sm:$0xf0] }
  0x82   :  { %v81_v31 = vsel %vm79_vm3, %v1065_v13, %v70_v19  ;;  %v841_v19 = vor.u32 %v929_v17, %v838_v18 }
  0x83   :  { %v353_v49 = vsel %vm347_vm5, %v351_v12, %v352_v36  ;;  %v344_v12 = vpop.permute.xlu2 %343 }
  0x84   :  { %356 = vrot.lane.b32.xlu2 %v353_v49, %s994_s21  ;;  %577 = vmatpush.bf16.msrb.mxu0 %v841_v19  ;;  %v390_v36 = vsel %vm388_vm7, %v1082_v33, %v344_v12  ;;  %v935_v33 = vld [vmem:[%s1345_s6 + $0x84] sm:$0xf] }
  0x85   :  { %v865_v48 = vor.u32 %v935_v33, %v862_v46  ;;  %v946_v33 = vld [vmem:[%s1347_s8 + $0x38] sm:$0xff]  ;;  %v945_v46 = vld [vmem:[%s1347_s8 + $0x30] sm:$0xff] }
  0x87   :  { %601 = vmatpush.bf16.msrb.mxu3 %v865_v48  ;;  %v944_v48 = vld [vmem:[%s1347_s8 + $0x28] sm:$0xff] }
  0x88   :  { %v78_v27 = vpop.permute.xlu1 %77  ;;  %578 = vmatpush.bf16.msrb.mxu0 %v833_v24 }
  0x89   :  { %v88_v32 = vsel %vm84_vm4, %v83_v26, %v78_v27  ;;  %v76_v35 = vpop.permute.xlu0 %75  ;;  %v387_v26 = vsel %vm381_vm6, %v385_v20, %v386_v21  ;;  %v822_v27 = vld [vmem:[%s1345_s6 + $0x38] sm:$0xf0] }
  0x8a   :  { %v93_v39 = vrot.slane %v88_v32, 2  ;;  %v94_v40 = vrot.slane %v88_v32, 4  ;;  %110 = vst [vmem:[#allocation1 + $0x3] ss:$4 sm:$0xff] %v88_v32  ;;  %v86_v13 = vsel %vm84_vm4, %v81_v31, %v76_v35  ;;  %875 = vmatmul.msk.bf16.gmra.mxu3 %vm388_vm7, %v387_v26  ;;  %v825_v30 = vor.u32 %v925_v63, %v822_v27  ;;  %v923_v31 = vld [vmem:[%s1345_s6 + $0x24] sm:$0xf] }
  0x8b   :  { %v91_v43 = vrot.slane %v86_v13, 2  ;;  %v92_v44 = vrot.slane %v86_v13, 4  ;;  %102 = vst [vmem:[#allocation1] ss:$4 sm:$0xff] %v86_v13  ;;  %v814_v32 = vld [vmem:[%s1345_s6 + $0x28] sm:$0xf0]  ;;  %v355_v37 = vpop.permute.xlu2 %354 }
  0x8c   :  { %113 = vst [vmem:[#allocation1 + $0x20] ss:$4 sm:$0xff] %v93_v39  ;;  %579 = vmatpush.bf16.msrb.mxu0 %v825_v30  ;;  %v817_v35 = vor.u32 %v923_v31, %v814_v32  ;;  %v395_v38 = vsel %vm393_vm9, %v390_v36, %v355_v37 }
  0x8d   :  { %116 = vst [vmem:[#allocation1 + $0x21] ss:$4 sm:$0xff] %v94_v40 }
  0x8e   :  { %105 = vst [vmem:[#allocation1 + $0x1] ss:$4 sm:$0xff] %v91_v43  ;;  %v806_v43 = vld [vmem:[%s1345_s6 + $0x18] sm:$0xf0] }
  0x8f   :  { %108 = vst [vmem:[#allocation1 + $0x2] ss:$4 sm:$0xff] %v92_v44  ;;  %v809_v45 = vor.u32 %v921_v42, %v806_v43 }
  0x90   :  { %580 = vmatpush.bf16.msrb.mxu0 %v817_v35  ;;  %v346_v41 = vpop.permute.xlu1 %345 }
  0x91   :  { %v378_v39 = vpop.permute.xlu0 %377  ;;  %v392_v44 = vsel %vm388_vm7, %v1108_v59, %v346_v41  ;;  %v798_v59 = vld [vmem:[%s1345_s6 + $0x8] sm:$0xf0] }
  0x92   :  { %v400_v40 = vsel %vm398_vm10, %v395_v38, %v378_v39  ;;  %v801_v52 = vor.u32 %v919_v51, %v798_v59 }
  0x93   :  { %545 = vmatmul.bf16.vlgmr.msra.gmra.mxu2 %v400_v40 }
  0x94   :  { %v118_v2 = vld.sshfl [vmem:[#allocation1 + $0x20] sm:$0xff pattern:$0x73625140]  ;;  %581 = vmatpush.bf16.msrb.mxu0 %v809_v45 }
  0x96   :  { %v117_v60 = vld.sshfl [vmem:[#allocation1] sm:$0xff pattern:$0x73625140] }
  0x97   :  { %760 = vmatmul.msk.bf16.vlgmr.msra.gmra.mxu0 %vm128_vm8, %v117_v60  ;;  %v914_v60 = vld [vmem:[%s1343_s4 + $0x18] sm:$0xff] }
  0x98   :  { %582 = vmatpush.bf16.msrb.mxu0 %v801_v52  ;;  %281 = vmatpush.bf16.msra.mxu1 %v914_v60  ;;  %v942_v52 = vld [vmem:[%s1347_s8 + $0x18] sm:$0xff] }
  0x99   :  { %v380_v49 = vpop.permute.xlu0 %379 }
  0x9a   :  { %876 = vmatmul.msk.bf16.vlgmr.msrb.gmra.mxu3 %vm388_vm7, %v1171_v56  ;;  %v953_v56 = vld [vmem:[%s1342_s3] ss:$0 sm:$0xff] }
  0x9c   :  { %282 = vmatpush.bf16.msra.mxu1 %v913_v0 }
  0xa0   :  { %283 = vmatpush.bf16.msra.mxu1 %v912_v3 }
  0xa4   :  { %284 = vmatpush.bf16.msra.mxu1 %v911_v6 }
  0xa7   :  { %761 = vmatmul.msk.bf16.gmra.mxu0 %vm128_vm8, %v118_v2 }
  0xa8   :  { %726 = vmatpush.bf16.msrb.mxu1 %v946_v33 }
  0xaa   :  { %877 = vmatmul.msk.bf16.gmra.mxu3 %vm388_vm7, %v387_v26 }
  0xac   :  { %727 = vmatpush.bf16.msrb.mxu1 %v945_v46 }
  0xb0   :  { %728 = vmatpush.bf16.msrb.mxu1 %v944_v48 }
  0xb7   :  { %583 = vmatmul.bf16.vlgmr.msrb.gmra.mxu0 %v400_v40  ;;  %v565_v40 = vpop.f32.mrf.mxu3 }
  0xde   :  { %v357_v13 = vpop.permute.xlu2 %356 }
  0xdf   :  { %v397_v47 = vsel %vm393_vm9, %v392_v44, %v357_v13  ;;  %v567_v13 = vpop.f32.mrf.mxu3 }
  0xe0   :  { %v403_v50 = vsel %vm398_vm10, %v397_v47, %v380_v49 }
  0xe1   :  { %550 = vmatmul.bf16.gmra.mxu2 %v403_v50  ;;  %588 = vmatmul.bf16.gmra.mxu0 %v403_v50  ;;  %v943_v50 = vld [vmem:[%s1347_s8 + $0x20] sm:$0xff] }
  0xe2   :  { %729 = vmatpush.bf16.msrb.mxu1 %v943_v50 }
  0xe6   :  { %730 = vmatpush.bf16.msrb.mxu1 %v942_v52 }
  0xea   :  { %731 = vmatpush.bf16.msrb.mxu1 %v941_v54 }
  0xee   :  { %732 = vmatpush.bf16.msrb.mxu1 %v940_v57 }
 0x10d   :  { %v570_v41 = vpop.f32.mrf.mxu3 }
 0x114   :  { %v146_v34 = vpop.f32.mrf.mxu0 }
 0x115   :  { %v147_v58 = vadd.f32 %v953_v56, %v146_v34  ;;  %v572_v43 = vpop.f32.mrf.mxu3 }
 0x116   :  { %v546_v42 = vpop.f32.mrf.mxu2 }
 0x117   :  { %v155_v61 = vmax.f32 %v147_v58, 0.0 }
 0x119   :  { %v161_v62 = vrot.slane %v155_v61, 4  ;;  %164 = vst [vmem:[#allocation1] ss:$2 sm:$0xff] %v155_v61 }
 0x11b   :  { %166 = vst [vmem:[#allocation1 + $0x1] ss:$2 sm:$0xff] %v161_v62  ;;  %v428_v62 = vperm.slane %v425_v53, 1 }
 0x11c   :  { %v148_v1 = vpop.f32.mrf.mxu0 }
 0x11d   :  { %v149_v2 = vadd.f32 %v953_v56, %v148_v1  ;;  %v603_v47 = vpop.f32.mrf.mxu3  ;;  %v939_v1 = vld [vmem:[%s1347_s8] sm:$0xff] }
 0x11e   :  { %v548_v45 = vpop.f32.mrf.mxu2  ;;  %733 = vmatpush.bf16.msrb.mxu1 %v939_v1 }
 0x11f   :  { %v156_v4 = vmax.f32 %v149_v2, 0.0 }
 0x121   :  { %v162_v5 = vrot.slane %v156_v4, 4  ;;  %168 = vst [vmem:[#allocation1 + $0x10] ss:$2 sm:$0xff] %v156_v4  ;;  %v954_v4 = vld [vmem:[%s1344_s5] ss:$0 sm:$0xff] }
 0x122   :  { %v169_v10 = vld.sshfl [vmem:[#allocation1] sm:$0xff pattern:$0x75316420] }
 0x123   :  { %172 = vst [vmem:[#allocation1 + $0x20] ss:$2 sm:$0xff] %v162_v5 }
 0x124   :  { %v151_v7 = vpop.f32.mrf.mxu0 }
 0x125   :  { %v152_v8 = vadd.f32 %v953_v56, %v151_v7  ;;  %v605_v59 = vpop.f32.mrf.mxu3  ;;  %v427_v56 = vperm.slane %v425_v53, 0 }
 0x127   :  { %v157_v9 = vmax.f32 %v152_v8, 0.0  ;;  %v547_v58 = vadd.f32 %v546_v42, %v427_v56  ;;  %v549_v61 = vadd.f32 %v548_v45, %v427_v56 }
 0x128   :  { %v170_v11 = vld.sshfl [vmem:[#allocation1 + $0x10] sm:$0xff pattern:$0x75316420] }
 0x129   :  { %v163_v14 = vrot.slane %v157_v9, 4  ;;  %174 = vst [vmem:[#allocation1 + $0x21] ss:$2 sm:$0xff] %v157_v9  ;;  %v183_v15 = vsel %vm133_vm0, %v170_v11, -inf  ;;  %v566_v3 = vadd.f32 %v565_v40, %v547_v58  ;;  %v568_v5 = vadd.f32 %v567_v13, %v549_v61  ;;  %v955_v58 = vld [vmem:[%s1348_s9] ss:$0 sm:$0xff] }
 0x12a   :  { %v184_v16 = vmax.f32 %v169_v10, %v183_v15 }
 0x12b   :  { %176 = vst [vmem:[#allocation1 + $0x30] ss:$2 sm:$0xff] %v163_v14  ;;  %956 = vtanh.f32 %v566_v3 }
 0x12c   :  { %v153_v17 = vpop.f32.mrf.mxu0  ;;  %v185_v18 = vrot.slane %v184_v16, 4  ;;  %958 = vtanh.f32 %v568_v5 }
 0x12d   :  { %v608_v34 = vpop.f32.mrf.mxu3 }
 0x12e   :  { %v186_v19 = vmax.f32 %v184_v16, %v185_v18 }
 0x130   :  { %v187_v20 = vrot.slane %v186_v19, 2  ;;  %v177_v22 = vld.sshfl [vmem:[#allocation1 + $0x20] sm:$0xff pattern:$0x75316420] }
 0x132   :  { %v178_v21 = vld.sshfl [vmem:[#allocation1 + $0x30] sm:$0xff pattern:$0x75316420]  ;;  %v188_v24 = vmax.f32 %v186_v19, %v187_v20 }
 0x133   :  { %v191_v23 = vsel %vm133_vm0, %v178_v21, -inf }
 0x134   :  { %v192_v25 = vmax.f32 %v177_v22, %v191_v23  ;;  %v189_v63 = vrot.slane %v188_v24, 1  ;;  %v584_v44 = vpop.f32.mrf.mxu0 }
 0x135   :  { %v585_v6 = vadd.f32 %v584_v44, %v428_v62  ;;  %v610_v18 = vpop.f32.mrf.mxu3 }
 0x136   :  { %v193_v26 = vrot.slane %v192_v25, 4  ;;  %v190_v29 = vmax.f32 %v188_v24, %v189_v63  ;;  %v957_v63 = vpop.eup %956 }
 0x137   :  { %v604_v17 = vadd.f32 %v603_v47, %v585_v6 }
 0x138   :  { %v194_v27 = vmax.f32 %v192_v25, %v193_v26  ;;  %v199_v35 = vpack.c.bf16 %v190_v29, %v190_v29 }
 0x13a   :  { %v195_v28 = vrot.slane %v194_v27, 2  ;;  %v223_v36 = vunpack.c.l.b16 %v199_v35 }
 0x13c   :  { %v196_v30 = vmax.f32 %v194_v27, %v195_v28  ;;  %v586_v49 = vpop.f32.mrf.mxu0 }
 0x13d   :  { %v587_v9 = vadd.f32 %v586_v49, %v428_v62 }
 0x13e   :  { %v197_v31 = vrot.slane %v196_v30, 1 }
 0x13f   :  { %v606_v19 = vadd.f32 %v605_v59, %v587_v9 }
 0x140   :  { %v198_v32 = vmax.f32 %v196_v30, %v197_v31  ;;  %v959_v31 = vpop.eup %958 }
 0x142   :  { %v200_v12 = vpack.c.bf16 %v198_v32, %v198_v32 }
 0x144   :  { %v224_v37 = vunpack.c.l.b16 %v200_v12 }
 0x146   :  { %v226_v38 = vsel %vm225_vm11, %v224_v37, %v223_v36 }
 0x147   :  { %v227_v39 = vpack.c.b16 %v226_v38, %v226_v38 }
 0x149   :  { %285 = vmatmul.bf16.vlgmr.msra.gmra.mxu1 %v227_v39 }
 0x15e   :  { %v589_v55 = vpop.f32.mrf.mxu0 }
 0x15f   :  { %v590_v11 = vadd.f32 %v589_v55, %v428_v62 }
 0x161   :  { %v609_v22 = vadd.f32 %v608_v34, %v590_v11 }
 0x164   :  { %v551_v51 = vpop.f32.mrf.mxu2 }
 0x165   :  { %v552_v0 = vadd.f32 %v551_v51, %v427_v56 }
 0x166   :  { %v591_v7 = vpop.f32.mrf.mxu0 }
 0x167   :  { %v571_v8 = vadd.f32 %v570_v41, %v552_v0  ;;  %v592_v15 = vadd.f32 %v591_v7, %v428_v62 }
 0x169   :  { %960 = vtanh.f32 %v571_v8  ;;  %v611_v23 = vadd.f32 %v610_v18, %v592_v15 }
 0x16c   :  { %v553_v60 = vpop.f32.mrf.mxu2 }
 0x16d   :  { %v554_v2 = vadd.f32 %v553_v60, %v427_v56 }
 0x16f   :  { %v573_v10 = vadd.f32 %v572_v43, %v554_v2  ;;  %v961_v35 = vpop.eup %960 }
 0x171   :  { %962 = vtanh.f32 %v573_v10 }
 0x177   :  { %v963_v39 = vpop.eup %962 }
 0x1c6   :  { %v286_v14 = vpop.f32.mrf.mxu1 }
 0x1c7   :  { %v287_v16 = vadd.f32 %v954_v4, %v286_v14 }
 0x1c9   :  { %v618_v20 = vrot.slane %v287_v16, 1  ;;  %v619_v21 = vperm.slane %v287_v16, 0 }
 0x1cb   :  { %v620_v24 = vperm.slane %v618_v20, 0  ;;  %v623_v25 = vadd.f32 %v619_v21, %v604_v17  ;;  %v624_v26 = vadd.f32 %v619_v21, %v606_v19 }
 0x1cd   :  { %v625_v27 = vadd.f32 %v620_v24, %v609_v22  ;;  %v626_v28 = vadd.f32 %v620_v24, %v611_v23  ;;  %v627_v29 = vmax.f32 %v623_v25, 0.0  ;;  %v628_v30 = vmax.f32 %v624_v26, 0.0 }
 0x1ce   :  { %v288_v32 = vpop.f32.mrf.mxu1 }
 0x1cf   :  { %v629_v12 = vmax.f32 %v625_v27, 0.0  ;;  %v630_v36 = vmax.f32 %v626_v28, 0.0  ;;  %v631_v37 = vmul.f32 %v957_v63, %v627_v29  ;;  %v632_v38 = vmul.f32 %v959_v31, %v628_v30 }
 0x1d1   :  { %v633_v40 = vmul.f32 %v961_v35, %v629_v12  ;;  %v634_v13 = vmul.f32 %v963_v39, %v630_v36  ;;  %v635_v41 = vmax.f32 %v631_v37, %v632_v38 }
 0x1d3   :  { %v636_v42 = vrot.slane %v635_v41, 4  ;;  %v642_v43 = vmax.f32 %v633_v40, %v634_v13 }
 0x1d5   :  { %v637_v33 = vmax.f32 %v635_v41, %v636_v42  ;;  %v643_v44 = vrot.slane %v642_v43, 4 }
 0x1d7   :  { %v638_v45 = vrot.slane %v637_v33, 2  ;;  %v644_v46 = vmax.f32 %v642_v43, %v643_v44 }
 0x1d9   :  { %v645_v47 = vrot.slane %v644_v46, 2  ;;  %v639_v48 = vmax.f32 %v637_v33, %v638_v45 }
 0x1db   :  { %v640_v49 = vrot.slane %v639_v48, 1  ;;  %v646_v50 = vmax.f32 %v644_v46, %v645_v47 }
 0x1dd   :  { %v641_v51 = vmax.f32 %v639_v48, %v640_v49  ;;  %v647_v59 = vrot.slane %v646_v50, 1 }
 0x1df   :  { %v648_v52 = vmax.f32 %v646_v50, %v647_v59  ;;  %v649_v53 = vpack.c.bf16 %v641_v51, %v641_v51 }
 0x1e1   :  { %v650_v54 = vpack.c.bf16 %v648_v52, %v648_v52  ;;  %v673_v55 = vunpack.c.l.b16 %v649_v53 }
 0x1e3   :  { %v674_v56 = vunpack.c.l.b16 %v650_v54 }
 0x1e5   :  { %v675_v57 = vsel %vm225_vm11, %v674_v56, %v673_v55 }
 0x1e6   :  { %v676_v34 = vpack.c.b16 %v675_v57, %v675_v57 }
 0x1e8   :  { %734 = vmatmul.bf16.vlgmr.msrb.gmra.mxu1 %v676_v34 }
 0x265   :  { %v735_v60 = vpop.f32.mrf.mxu1 }
 0x266   :  { %v736_v61 = vadd.f32 %v955_v58, %v735_v60 }
 0x268   :  { %739 = vst [vmem:[#allocation2] sm:$0x3] %v736_v61 }
 0x269   :  { %750 = dma.vmem_to_hbm [thread:$0]  %s746_s2, 32, %s748_s20, [#allocation3]  }
 0x26d   :  { %v737_v62 = vpop.f32.mrf.mxu1 }
 0x26e   :  { %988 = dma.done.wait [#allocation3], 32  }
 0x26f   :  { %989 = vsyncadd [#allocation3], 4294967264 }
 0x270   :  { %755 = vsyncpa [#allocation3], 1 }

</bundles_post_ra>
